<compile_context>
chip_gen: v6e
topology: v6e:2x2x1
jax: 0.10.0
libtpu: 0.0.40
codegen_flags: <defaults>
</compile_context>

<pallas_src>
import functools
import math

import jax
import jax.numpy as jnp
from jax.experimental import pallas as pl
from jax.experimental.pallas import tpu as pltpu


TILE_M = 4096     # rows per grid step (f32 tile = 4096*128*4 B = 2 MiB)
LANES = 128       # lane width (fast axis)
ACC_ROWS = 32     # sublane rows of the persistent lane-parallel accumulator
NUM_CORES = 2     # leading "parallel" grid axis (v7x dual-TC; sequential elsewhere)


def _entropy_loss_kernel(p_ref, q_ref, out_ref, *,
                         m_rows, tile_m, steps_per_core, grid_m, need_mask):
    """Accumulate sum(q * log(p)) into this core's (ACC_ROWS, LANES) output block."""
    c = pl.program_id(0)          # core slot (parallel axis)
    i = pl.program_id(1)          # step within this core (reduction axis)
    b = c * steps_per_core + i    # logical row-tile index

    @pl.when(i == 0)
    def _():
        out_ref[...] = jnp.zeros_like(out_ref)

    def _contrib():
        p = p_ref[...].astype(jnp.float32)
        q = q_ref[...].astype(jnp.float32)
        return q * jnp.log(p)     # VPU mul + EUP log, hidden under DMA

    def _accumulate(contrib):
        # Reduce only along the non-vreg axis: sublane-grouped VPU adds into
        # ACC_ROWS independent accumulator rows (parallel add chains).
        out_ref[...] += contrib.reshape(tile_m // ACC_ROWS, ACC_ROWS, LANES).sum(axis=0)

    # Fast, unmasked path for every full tile.
    fast_limit = grid_m - 1 if need_mask else grid_m

    @pl.when(b < fast_limit)
    def _():
        _accumulate(_contrib())

    if need_mask:
        # Only the last real tile can contain rows >= m_rows (partial Pallas
        # block -> garbage rows whose log() may be NaN; the select discards them).
        @pl.when(b == grid_m - 1)
        def _():
            row = jax.lax.broadcasted_iota(jnp.int32, (tile_m, LANES), 0)
            valid = (b * tile_m + row) < m_rows   # row-based: no int32 overflow
            _accumulate(jnp.where(valid, _contrib(), 0.0))

    # Tiles with b >= grid_m (odd grid split across cores) contribute nothing.


def entropy_loss(p, q, *, tile_rows=None):
    """Pallas TPU implementation of EntropyLoss.forward(p, q) = -(q * log(p)).sum()."""
    assert p.shape == q.shape, "p and q must have the same shape"
    total = math.prod(p.shape)
    if total == 0:
        return jnp.float32(0.0)

    p_flat = jnp.reshape(p, (-1,))
    q_flat = jnp.reshape(q, (-1,))

    m_rows = total // LANES
    rem = total - m_rows * LANES

    # <128-element flat remainder: tiny plain-jnp reduction (avoids a
    # full-array concatenate copy of both inputs).
    tail_sum = jnp.float32(0.0)
    if rem:
        p_tail = p_flat[m_rows * LANES:].astype(jnp.float32)
        q_tail = q_flat[m_rows * LANES:].astype(jnp.float32)
        tail_sum = jnp.sum(q_tail * jnp.log(p_tail))

    if m_rows == 0:
        return -tail_sum

    p2 = (p_flat[: m_rows * LANES] if rem else p_flat).reshape(m_rows, LANES)
    q2 = (q_flat[: m_rows * LANES] if rem else q_flat).reshape(m_rows, LANES)

    # Row-tile: large (amortizes ~0.35us/step pipeline overhead), capped to the
    # array size rounded up to the accumulator height.
    max_tile = TILE_M if tile_rows is None else max(ACC_ROWS, (tile_rows // ACC_ROWS) * ACC_ROWS)
    tile_m = min(max_tile, ((m_rows + ACC_ROWS - 1) // ACC_ROWS) * ACC_ROWS)
    grid_m = pl.cdiv(m_rows, tile_m)
    need_mask = (m_rows % tile_m) != 0

    num_cores = min(NUM_CORES, grid_m)
    steps_per_core = pl.cdiv(grid_m, num_cores)

    if num_cores * steps_per_core == grid_m:
        def in_map(c, i):
            return (c * steps_per_core + i, 0)
    else:
        # Odd split: clamp the block index for the wrap step; the kernel skips
        # its contribution (b >= grid_m).
        def in_map(c, i):
            return (jnp.minimum(c * steps_per_core + i, grid_m - 1), 0)

    kernel = functools.partial(
        _entropy_loss_kernel,
        m_rows=m_rows, tile_m=tile_m,
        steps_per_core=steps_per_core, grid_m=grid_m, need_mask=need_mask,
    )

    itemsize = jnp.dtype(p.dtype).itemsize
    cost = pl.CostEstimate(
        flops=2 * total,
        transcendentals=total,
        bytes_accessed=2 * total * itemsize + num_cores * ACC_ROWS * LANES * 4,
    )

    partials = pl.pallas_call(
        kernel,
        out_shape=jax.ShapeDtypeStruct((num_cores, ACC_ROWS, LANES), jnp.float32),
        grid_spec=pltpu.PrefetchScalarGridSpec(
            num_scalar_prefetch=0,
            grid=(num_cores, steps_per_core),
            in_specs=[
                pl.BlockSpec((tile_m, LANES), in_map),
                pl.BlockSpec((tile_m, LANES), in_map),
            ],
            # Per-core accumulator lives in the VMEM-resident output block
            # (constant along the reduction axis).
            out_specs=pl.BlockSpec((None, ACC_ROWS, LANES), lambda c, i: (c, 0, 0)),
        ),
        compiler_params=pltpu.CompilerParams(
            dimension_semantics=("parallel", "arbitrary"),
        ),
        cost_estimate=cost,
    )(p2, q2)

    # One tiny cross-lane reduce + negate, outside the hot loop.
    return -(jnp.sum(partials) + tail_sum)


if __name__ == "__main__":
    key = jax.random.PRNGKey(0)
    kp, kq, kp2, kq2, kp3, kq3, kp4, kq4 = jax.random.split(key, 8)

    def check(loss, p, q, rtol=1e-5, atol=1e-4):
        ref = -jnp.sum(q.astype(jnp.float32) * jnp.log(p.astype(jnp.float32)))
        assert jnp.allclose(loss, ref, rtol=rtol, atol=atol), (loss, ref)

    # Case 1: NCHW-like probability tensors (flat size divisible by 128).
    shape = (2, 4, 16, 16)
    p_logits = jax.random.normal(kp, shape, dtype=jnp.float32)
    p1 = jax.nn.softmax(p_logits.reshape(shape[0], -1), axis=-1).reshape(shape)
    q_logits = jax.random.normal(kq, shape, dtype=jnp.float32)
    q1 = jax.nn.softmax(q_logits.reshape(shape[0], -1), axis=-1).reshape(shape)
    check(jax.block_until_ready(entropy_loss(p1, q1)), p1, q1)

    # Case 2: odd flat size (exercises the plain-jnp <128-element tail path
    # and in-kernel row masking of the partial block).
    shape2 = (3, 5, 7, 11)
    p2 = jax.random.uniform(kp2, shape2, jnp.float32, minval=0.1, maxval=1.0)
    q2 = jax.random.uniform(kq2, shape2, jnp.float32, minval=0.0, maxval=1.0)
    check(jax.block_until_ready(entropy_loss(p2, q2)), p2, q2)

    # Case 3: small tile override -> 2 tiles, 2-core split, masked last tile.
    shape3 = (33, 128)
    p3 = jax.random.uniform(kp3, shape3, jnp.float32, minval=0.1, maxval=1.0)
    q3 = jax.random.uniform(kq3, shape3, jnp.float32, minval=0.0, maxval=1.0)
    check(jax.block_until_ready(entropy_loss(p3, q3, tile_rows=32)), p3, q3)

    # Case 4: odd tile count (3) across 2 cores -> clamped index map + skipped
    # wrap step, no tail mask.
    shape4 = (96, 128)
    p4 = jax.random.uniform(kp4, shape4, jnp.float32, minval=0.1, maxval=1.0)
    q4 = jax.random.uniform(kq4, shape4, jnp.float32, minval=0.0, maxval=1.0)
    check(jax.block_until_ready(entropy_loss(p4, q4, tile_rows=32)), p4, q4)

    print("KERNEL_OK")
</pallas_src>

<mosaic_0001>
module attributes {stable_mosaic.version = 11 : i64} {
  func.func @_entropy_loss_kernel(%arg0: i32, %arg1: i32, %arg2: memref<32x128xf32, #tpu.memory_space<vmem>>, %arg3: memref<32x128xf32, #tpu.memory_space<vmem>>, %arg4: memref<1x32x128xf32, #tpu.memory_space<vmem>>) attributes {dimension_semantics = [#tpu.dimension_semantics<parallel>, #tpu.dimension_semantics<arbitrary>], iteration_bounds = array<i64: 1, 1>, scalar_prefetch = 0 : i64, scratch_operands = 0 : i64, tpu.core_type = #tpu.core_type<tc>, window_params = [{transform_indices = @transform_0, window_bounds = array<i64: 32, 128>}, {transform_indices = @transform_1, window_bounds = array<i64: 32, 128>}, {transform_indices = @transform_2, window_bounds = array<i64: 1, 32, 128>}]} {
    %c1_i32 = arith.constant 1 : i32
    %0 = arith.muli %arg0, %c1_i32 : i32
    %1 = arith.addi %0, %arg1 : i32
    %c0_i32 = arith.constant 0 : i32
    %2 = arith.cmpi eq, %arg1, %c0_i32 : i32
    %3 = arith.extui %2 : i1 to i32
    %c0_i32_0 = arith.constant 0 : i32
    %4 = arith.cmpi ne, %3, %c0_i32_0 : i32
    scf.if %4 {
      %cst = arith.constant 0.000000e+00 : f32
      %11 = vector.broadcast %cst : f32 to vector<32x128xf32>
      %c0 = arith.constant 0 : index
      %c0_5 = arith.constant 0 : index
      %c0_6 = arith.constant 0 : index
      %12 = vector.load %arg4[%c0, %c0_5, %c0_6] : memref<1x32x128xf32, #tpu.memory_space<vmem>>, vector<1x32x128xf32>
      %13 = vector.shape_cast %12 : vector<1x32x128xf32> to vector<32x128xf32>
      %14 = vector.shape_cast %11 : vector<32x128xf32> to vector<1x32x128xf32>
      tpu.vector_store %arg4[%c0, %c0_5, %c0_6], %14 {strides = array<i32>} : memref<1x32x128xf32, #tpu.memory_space<vmem>>, vector<1x32x128xf32>,
    } else {
    }
    %c0_i32_1 = arith.constant 0 : i32
    %5 = arith.cmpi slt, %1, %c0_i32_1 : i32
    %6 = arith.extui %5 : i1 to i32
    %c0_i32_2 = arith.constant 0 : i32
    %7 = arith.cmpi ne, %6, %c0_i32_2 : i32
    scf.if %7 {
      %c0 = arith.constant 0 : index
      %c0_5 = arith.constant 0 : index
      %11 = vector.load %arg2[%c0, %c0_5] : memref<32x128xf32, #tpu.memory_space<vmem>>, vector<32x128xf32>
      %c0_6 = arith.constant 0 : index
      %c0_7 = arith.constant 0 : index
      %12 = vector.load %arg3[%c0_6, %c0_7] : memref<32x128xf32, #tpu.memory_space<vmem>>, vector<32x128xf32>
      %13 = math.log %11 : vector<32x128xf32>
      %14 = arith.mulf %12, %13 : vector<32x128xf32>
      %c0_8 = arith.constant 0 : index
      %c0_9 = arith.constant 0 : index
      %c0_10 = arith.constant 0 : index
      %15 = vector.load %arg4[%c0_8, %c0_9, %c0_10] : memref<1x32x128xf32, #tpu.memory_space<vmem>>, vector<1x32x128xf32>
      %16 = vector.shape_cast %15 : vector<1x32x128xf32> to vector<32x128xf32>
      %17 = vector.shape_cast %14 : vector<32x128xf32> to vector<1x32x128xf32>
      %cst = arith.constant dense<0.000000e+00> : vector<32x128xf32>
      %18 = vector.multi_reduction <add>, %17, %cst [0] : vector<1x32x128xf32> to vector<32x128xf32>
      %19 = arith.addf %16, %18 : vector<32x128xf32>
      %c0_11 = arith.constant 0 : index
      %c0_12 = arith.constant 0 : index
      %c0_13 = arith.constant 0 : index
      %20 = vector.load %arg4[%c0_11, %c0_12, %c0_13] : memref<1x32x128xf32, #tpu.memory_space<vmem>>, vector<1x32x128xf32>
      %21 = vector.shape_cast %20 : vector<1x32x128xf32> to vector<32x128xf32>
      %22 = vector.shape_cast %19 : vector<32x128xf32> to vector<1x32x128xf32>
      tpu.vector_store %arg4[%c0_11, %c0_12, %c0_13], %22 {strides = array<i32>} : memref<1x32x128xf32, #tpu.memory_space<vmem>>, vector<1x32x128xf32>,
    } else {
    }
    %c0_i32_3 = arith.constant 0 : i32
    %8 = arith.cmpi eq, %1, %c0_i32_3 : i32
    %9 = arith.extui %8 : i1 to i32
    %c0_i32_4 = arith.constant 0 : i32
    %10 = arith.cmpi ne, %9, %c0_i32_4 : i32
    scf.if %10 {
      %11 = tpu.iota {dimensions = array<i32: 0>} : vector<32x128xi32>
      %c32_i32 = arith.constant 32 : i32
      %12 = arith.muli %1, %c32_i32 : i32
      %13 = vector.broadcast %12 : i32 to vector<32x128xi32>
      %14 = arith.addi %13, %11 : vector<32x128xi32>
      %c16_i32 = arith.constant 16 : i32
      %15 = vector.broadcast %c16_i32 : i32 to vector<32x128xi32>
      %16 = arith.cmpi slt, %14, %15 : vector<32x128xi32>
      %c0 = arith.constant 0 : index
      %c0_5 = arith.constant 0 : index
      %17 = vector.load %arg2[%c0, %c0_5] : memref<32x128xf32, #tpu.memory_space<vmem>>, vector<32x128xf32>
      %c0_6 = arith.constant 0 : index
      %c0_7 = arith.constant 0 : index
      %18 = vector.load %arg3[%c0_6, %c0_7] : memref<32x128xf32, #tpu.memory_space<vmem>>, vector<32x128xf32>
      %19 = math.log %17 : vector<32x128xf32>
      %20 = arith.mulf %18, %19 : vector<32x128xf32>
      %cst = arith.constant 0.000000e+00 : f32
      %21 = vector.broadcast %cst : f32 to vector<32x128xf32>
      %22 = arith.select %16, %20, %21 : vector<32x128xi1>, vector<32x128xf32>
      %c0_8 = arith.constant 0 : index
      %c0_9 = arith.constant 0 : index
      %c0_10 = arith.constant 0 : index
      %23 = vector.load %arg4[%c0_8, %c0_9, %c0_10] : memref<1x32x128xf32, #tpu.memory_space<vmem>>, vector<1x32x128xf32>
      %24 = vector.shape_cast %23 : vector<1x32x128xf32> to vector<32x128xf32>
      %25 = vector.shape_cast %22 : vector<32x128xf32> to vector<1x32x128xf32>
      %cst_11 = arith.constant dense<0.000000e+00> : vector<32x128xf32>
      %26 = vector.multi_reduction <add>, %25, %cst_11 [0] : vector<1x32x128xf32> to vector<32x128xf32>
      %27 = arith.addf %24, %26 : vector<32x128xf32>
      %c0_12 = arith.constant 0 : index
      %c0_13 = arith.constant 0 : index
      %c0_14 = arith.constant 0 : index
      %28 = vector.load %arg4[%c0_12, %c0_13, %c0_14] : memref<1x32x128xf32, #tpu.memory_space<vmem>>, vector<1x32x128xf32>
      %29 = vector.shape_cast %28 : vector<1x32x128xf32> to vector<32x128xf32>
      %30 = vector.shape_cast %27 : vector<32x128xf32> to vector<1x32x128xf32>
      tpu.vector_store %arg4[%c0_12, %c0_13, %c0_14], %30 {strides = array<i32>} : memref<1x32x128xf32, #tpu.memory_space<vmem>>, vector<1x32x128xf32>,
    } else {
    }
    return
  }
  func.func @transform_0(%arg0: i32, %arg1: i32) -> (i32, i32) {
    %c1_i32 = arith.constant 1 : i32
    %0 = arith.muli %arg0, %c1_i32 : i32
    %1 = arith.addi %0, %arg1 : i32
    %c0_i32 = arith.constant 0 : i32
    %c0_i32_0 = arith.constant 0 : i32
    return %1, %c0_i32 : i32, i32
  }
  func.func @transform_1(%arg0: i32, %arg1: i32) -> (i32, i32) {
    %c1_i32 = arith.constant 1 : i32
    %0 = arith.muli %arg0, %c1_i32 : i32
    %1 = arith.addi %0, %arg1 : i32
    %c0_i32 = arith.constant 0 : i32
    %c0_i32_0 = arith.constant 0 : i32
    return %1, %c0_i32 : i32, i32
  }
  func.func @transform_2(%arg0: i32, %arg1: i32) -> (i32, i32, i32) {
    %c0_i32 = arith.constant 0 : i32
    %c0_i32_0 = arith.constant 0 : i32
    %c0_i32_1 = arith.constant 0 : i32
    return %arg0, %c0_i32, %c0_i32_0 : i32, i32, i32
  }
}

</mosaic_0001>

<bundles_post_ra>
// kernel: tpu_custom_call.1
= control target key start
LH: loop header
LB: loop body
LE: loop exit
PB: predicated region body
PF: predicated region fallthrough
CT: control target
= control target key end

     0   :  { %7 = vsyncpa [#allocation3], 0  ;;  %s305_s0 = inlined_call_operand.hbm [shape: f32[16,128], index: 0, kind: input, shape index: {}]   ;;  %s306_s1 = inlined_call_operand.hbm [shape: f32[16,128], index: 1, kind: input, shape index: {}]   ;;  %s307_s2 = inlined_call_operand.hbm [shape: f32[1,32,128], index: 2, kind: output, shape index: {}]  }
   0x1   :  { %8 = vsyncpa [#allocation6], 0 }
   0x2   :  { %9 = vsyncpa [#allocation4], 0 }
   0x3   :  { %18 = vsyncadd [#allocation3], 256  ;;  %s266_s9 = smov [#allocation2]  }
   0x4   :  { %s23_s10 = sshll.u32 %s266_s9, 4  ;;  %s24_s10 = int_to_ptr.vmem [resolvable:$true] %s23_s10 }
   0x5   :  { %s208_s11 = scalar_lea.vmem %s24_s10, 256  ;;  %s212_s12 = scalar_lea.vmem %s24_s10, 512 }
   0x6   :  { %p209_p0 = scmp.ne.s32.totalorder %s24_s10, %s208_s11  ;;  %p213_p1 = scmp.lt.s32.totalorder %s24_s10, %s24_s10 }
   0x7   :  { %p214_p2 = scmp.lt.s32.totalorder %s212_s12, %s208_s11 }
   0x9   :  { %p215_p3 = por %p214_p2, %p213_p1 }
   0xb   :  { %p216_p4 = pnand %p215_p3, %p209_p0 }
   0xd   :  { %219 = shalt.err (!%p216_p4)
}
   0xe   :  { %s267_s13 = smov 128   ;;  %s268_s14 = smov 8  }
   0xf   :  { %29 = dma.hbm_to_vmem [thread:$0]  %s305_s0, 256, %s24_s10, [#allocation3], %s267_s13, %s267_s13, %s268_s14  }
  0x10   :  { %38 = vsyncadd [#allocation6], 256  ;;  %s269_s17 = smov [#allocation5]  }
  0x11   :  { %s43_s18 = sshll.u32 %s269_s17, 4  ;;  %s44_s18 = int_to_ptr.vmem [resolvable:$true] %s43_s18 }
  0x12   :  { %s228_s19 = scalar_lea.vmem %s44_s18, 256  ;;  %s232_s20 = scalar_lea.vmem %s44_s18, 512 }
  0x13   :  { %p229_p5 = scmp.ne.s32.totalorder %s44_s18, %s228_s19  ;;  %p233_p6 = scmp.lt.s32.totalorder %s44_s18, %s44_s18 }
  0x14   :  { %p234_p7 = scmp.lt.s32.totalorder %s232_s20, %s228_s19 }
  0x16   :  { %p235_p8 = por %p234_p7, %p233_p6 }
  0x18   :  { %p236_p9 = pnand %p235_p8, %p229_p5 }
  0x1a   :  { %239 = shalt.err (!%p236_p9)
}
  0x1b   :  { %49 = dma.hbm_to_vmem [thread:$0]  %s306_s1, 256, %s44_s18, [#allocation6], %s267_s13, %s267_s13, %s268_s14  }
  0x1c   :  { %260 = dma.done.wait [#allocation3], 512  }
  0x1d   :  { %261 = vsyncadd [#allocation3], 4294966784 }
  0x1e   :  { %262 = dma.done.wait [#allocation6], 512  }
  0x1f   :  { %263 = vsyncadd [#allocation6], 4294966784  ;;  %v270_v0 = vmov 0.0   ;;  %v132_v1 = vld [vmem:[#allocation2] sm:$0xff]  ;;  %v133_v2 = vld [vmem:[#allocation2 + $0x8] sm:$0xff]  ;;  %s271_s0 = smov [#allocation7]  }
  0x20   :  { %170 = vst [vmem:[#allocation7 + $0x10] sm:$0xff] %v270_v0  ;;  %171 = vst [vmem:[#allocation7 + $0x18] sm:$0xff] %v270_v0  ;;  %196 = vlog2.f32 %v132_v1  ;;  %v136_v4 = vld [vmem:[#allocation5] sm:$0xff]  ;;  %v137_v7 = vld [vmem:[#allocation5 + $0x8] sm:$0xff]  ;;  %s177_s1 = sshll.u32 %s271_s0, 4  ;;  %s178_s1 = int_to_ptr.vmem [resolvable:$true] %s177_s1 }
  0x21   :  { %198 = vlog2.f32 %v133_v2  ;;  %s240_s23 = scalar_lea.vmem %s178_s1, 512  ;;  %p245_p11 = scmp.lt.s32.totalorder %s178_s1, %s178_s1 }
  0x22   :  { %p241_p10 = scmp.ne.s32.totalorder %s178_s1, %s240_s23  ;;  %p246_p12 = scmp.lt.s32.totalorder %s240_s23, %s240_s23 }
  0x24   :  { %p247_p13 = por %p246_p12, %p245_p11 }
  0x26   :  { %p248_p0 = pnand %p247_p13, %p241_p10 }
  0x2d   :  { %v197_v3 = vpop.eup %196 }
  0x2e   :  { %v199_v5 = vpop.eup %198  ;;  %v141_v6 = vmul.f32 0.6931472, %v197_v3 }
  0x2f   :  { %v143_v8 = vmul.f32 0.6931472, %v199_v5 }
  0x30   :  { %v148_v9 = vmul.f32 %v141_v6, %v136_v4 }
  0x31   :  { %v149_v10 = vmul.f32 %v143_v8, %v137_v7 }
  0x32   :  { %168 = vst [vmem:[#allocation7] sm:$0xff] %v148_v9 }
  0x33   :  { %169 = vst [vmem:[#allocation7 + $0x8] sm:$0xff] %v149_v10 }
  0x34   :  { %251 = shalt.err (!%p248_p0)
}
  0x35   :  { %183 = dma.vmem_to_hbm [thread:$0]  %s178_s1, 512, %s307_s2, [#allocation4], %s267_s13, %s267_s13, %s268_s14  }
  0x36   :  { %264 = dma.done.wait [#allocation4], 512  }
  0x37   :  { %265 = vsyncadd [#allocation4], 4294966784 }
  0x38   :  { %187 = vsyncpa [#allocation3], 1 }
  0x39   :  { %188 = vsyncpa [#allocation6], 1 }
  0x3a   :  { %189 = vsyncpa [#allocation4], 1 }

</bundles_post_ra>
